<compile_context>
chip_gen: v7x
topology: tpu7x:2x2x1
jax: 0.10.0
libtpu: 0.0.40
codegen_flags: <defaults>
</compile_context>

<pallas_src>
import jax
import jax.numpy as jnp
from jax.experimental import pallas as pl
from jax.experimental.pallas import tpu as pltpu

SIZE = 1  # module-level `size` from the PyTorch script


def _round_up(x, m):
    return ((x + m - 1) // m) * m


def _sublane_multiple(dtype):
    # f32 -> 8 sublanes, bf16 -> 16, int8/fp8 -> 32 (sub-32-bit packs along sublanes)
    itemsize = jnp.dtype(dtype).itemsize
    return 8 * max(1, 4 // int(itemsize))


def _make_kernel(F1, F2, size):
    """v4 assembled in registers, written with a single full-block store."""
    s1 = min(size, F1)   # part of the tail slice coming from x1
    s2 = size - s1       # spill into x2 when size > F1 (0 in the spec case)

    def kernel(x1_ref, x2_ref, o_ref):
        x1 = x1_ref[...]
        x2 = x2_ref[...]
        parts = [x1, x2]          # v1 = cat([x1, x2], dim=1)
        if s1 > 0:
            parts.append(x1[:, :s1])   # v3 = v1[:, :size] (x1 part)
        if s2 > 0:
            parts.append(x2[:, :s2])   # v3 spill into x2
        # One store for the whole tile (replaces 3-4 masked lane-slice stores).
        o_ref[...] = jnp.concatenate(parts, axis=1)

    return kernel


def cat_slice_cat(x1, x2, size=SIZE):
    assert x1.ndim == 2 and x2.ndim == 2
    assert x1.shape[0] == x2.shape[0]
    assert x1.dtype == x2.dtype
    B, F1 = x1.shape
    _, F2 = x2.shape

    # PyTorch slicing clamps: v3 has at most F1+F2 columns.
    size_eff = min(int(size), F1 + F2)
    Fout = F1 + F2 + size_eff
    dtype = x1.dtype
    itemsize = int(jnp.dtype(dtype).itemsize)

    kernel = _make_kernel(F1, F2, size_eff)
    out_shape = jax.ShapeDtypeStruct((B, Fout), dtype)

    # Pure data movement: no flops, just read x1+x2 and write v4.
    cost = pl.CostEstimate(
        flops=0,
        transcendentals=0,
        bytes_accessed=B * (F1 + F2 + Fout) * itemsize,
    )

    SMALL_B = 1024  # below this the op is per-call-overhead bound: one gridless call

    if B <= SMALL_B:
        return pl.pallas_call(
            kernel,
            out_shape=out_shape,
            in_specs=[
                pl.BlockSpec(memory_space=pltpu.MemorySpace.VMEM),
                pl.BlockSpec(memory_space=pltpu.MemorySpace.VMEM),
            ],
            out_specs=pl.BlockSpec(memory_space=pltpu.MemorySpace.VMEM),
            cost_estimate=cost,
        )(x1, x2)

    # ---- Tiled path (large batch) -------------------------------------------
    # Padded VMEM footprint per TB rows: last dim pads to 128 lanes, and every
    # operand is double-buffered by the default pipeline.
    pad = lambda f: _round_up(f, 128)
    padded_row_bytes = (pad(F1) + pad(F2) + pad(Fout)) * itemsize
    sub = _sublane_multiple(dtype)

    VMEM_BUDGET = 24 * 1024 * 1024  # fits v7x's 32 MiB default scope / 64 MiB physical
    tb_vmem_cap = max(sub, VMEM_BUDGET // (2 * padded_row_bytes))
    # Keep at least 2 tiles so the batch axis can shard across v7x's 2 TCs.
    tb_two_tiles = _round_up(pl.cdiv(B, 2), sub)
    TB = min(8192, tb_vmem_cap, tb_two_tiles)
    TB = max(sub, (TB // sub) * sub)

    grid = (pl.cdiv(B, TB),)
    # Explicit scoped-VMEM limit from the padded math (+ headroom); also lifts
    # v5e's 16 MiB default. Always well under v7x's 64 MiB physical VMEM.
    vmem_limit = max(
        int(2 * padded_row_bytes * TB * 1.5) + (2 << 20),
        32 * 1024 * 1024,
    )

    return pl.pallas_call(
        kernel,
        out_shape=out_shape,
        grid=grid,
        in_specs=[
            pl.BlockSpec((TB, F1), lambda i: (i, 0)),
            pl.BlockSpec((TB, F2), lambda i: (i, 0)),
        ],
        out_specs=pl.BlockSpec((TB, Fout), lambda i: (i, 0)),
        compiler_params=pltpu.CompilerParams(
            dimension_semantics=("parallel",),
            vmem_limit_bytes=vmem_limit,
        ),
        cost_estimate=cost,
    )(x1, x2)


def _reference(x1, x2, size=SIZE):
    v1 = jnp.concatenate([x1, x2], axis=1)
    v3 = v1[:, :min(int(size), v1.shape[1])]
    return jnp.concatenate([v1, v3], axis=1)


if __name__ == "__main__":
    key = jax.random.PRNGKey(0)
    k1, k2, k3, k4, k5, k6 = jax.random.split(key, 6)

    # Small case matching the module: 2-D inputs, cat on dim=1, size=1.
    x1 = jax.random.normal(k1, (4, 16), dtype=jnp.float32)
    x2 = jax.random.normal(k2, (4, 16), dtype=jnp.float32)
    out = jax.block_until_ready(cat_slice_cat(x1, x2))
    ref = _reference(x1, x2)
    assert out.shape == (4, 16 + 16 + SIZE), out.shape
    assert jnp.allclose(out, ref), "mismatch vs reference (small)"

    # Larger batch: exercises the tiled ("parallel", 2-tile) path.
    y1 = jax.random.normal(k3, (2048, 16), dtype=jnp.float32)
    y2 = jax.random.normal(k4, (2048, 16), dtype=jnp.float32)
    out2 = jax.block_until_ready(cat_slice_cat(y1, y2))
    ref2 = _reference(y1, y2)
    assert out2.shape == (2048, 16 + 16 + SIZE), out2.shape
    assert jnp.allclose(out2, ref2), "mismatch vs reference (tiled)"

    # Ragged batch: B not a multiple of the tile (partial last block writeback).
    z1 = jax.random.normal(k5, (2049, 16), dtype=jnp.float32)
    z2 = jax.random.normal(k6, (2049, 16), dtype=jnp.float32)
    out3 = jax.block_until_ready(cat_slice_cat(z1, z2))
    ref3 = _reference(z1, z2)
    assert out3.shape == (2049, 16 + 16 + SIZE), out3.shape
    assert jnp.allclose(out3, ref3), "mismatch vs reference (ragged tiled)"

    print("KERNEL_OK")
</pallas_src>

<mosaic_0001>
module attributes {stable_mosaic.version = 11 : i64} {
  func.func @kernel(%arg0: memref<4x16xf32, #tpu.memory_space<vmem>>, %arg1: memref<4x16xf32, #tpu.memory_space<vmem>>, %arg2: memref<4x33xf32, #tpu.memory_space<vmem>>) attributes {dimension_semantics = [], scalar_prefetch = 0 : i64, scratch_operands = 0 : i64, tpu.core_type = #tpu.core_type<tc>} {
    %c0 = arith.constant 0 : index
    %c0_0 = arith.constant 0 : index
    %0 = vector.load %arg0[%c0, %c0_0] : memref<4x16xf32, #tpu.memory_space<vmem>>, vector<4x16xf32>
    %c0_1 = arith.constant 0 : index
    %c0_2 = arith.constant 0 : index
    %1 = vector.load %arg1[%c0_1, %c0_2] : memref<4x16xf32, #tpu.memory_space<vmem>>, vector<4x16xf32>
    %2 = vector.extract_strided_slice %0 {offsets = [0, 0], sizes = [4, 1], strides = [1, 1]} : vector<4x16xf32> to vector<4x1xf32>
    %3 = tpu.concatenate %0, %1, %2 in 1 : vector<4x16xf32>, vector<4x16xf32>, vector<4x1xf32> -> vector<4x33xf32>
    %c0_3 = arith.constant 0 : index
    %c0_4 = arith.constant 0 : index
    %4 = vector.load %arg2[%c0_3, %c0_4] : memref<4x33xf32, #tpu.memory_space<vmem>>, vector<4x33xf32>
    tpu.vector_store %arg2[%c0_3, %c0_4], %3 {strides = array<i32>} : memref<4x33xf32, #tpu.memory_space<vmem>>, vector<4x33xf32>,
    return
  }
}

</mosaic_0001>

<bundles_post_ra>
// kernel: tpu_custom_call.1
= control target key start
LH: loop header
LB: loop body
LE: loop exit
PB: predicated region body
PF: predicated region fallthrough
CT: control target
= control target key end

     0   :  { %7 = vsyncpa [#allocation3], 0  ;;  %s201_s0 = inlined_call_operand.hbm [shape: f32[4,16], index: 0, kind: input, shape index: {}]   ;;  %s202_s1 = inlined_call_operand.hbm [shape: f32[4,16], index: 1, kind: input, shape index: {}]   ;;  %s203_s2 = inlined_call_operand.hbm [shape: f32[4,33], index: 2, kind: output, shape index: {}]  }
   0x1   :  { %8 = vsyncpa [#allocation6], 0 }
   0x2   :  { %9 = vsyncpa [#allocation4], 0  ;;  %s145_s9 = smov [#allocation2]   ;;  %s146_s11 = smov [#allocation5]  }
   0x3   :  { %s16_s10 = sshll.u32 %s145_s9, 4  ;;  %s26_s12 = sshll.u32 %s146_s11, 4  ;;  %s17_s10 = int_to_ptr.vmem [resolvable:$true] %s16_s10  ;;  %s27_s12 = int_to_ptr.vmem [resolvable:$true] %s26_s12 }
   0x4   :  { %s73_s15 = scalar_lea.hbm %s201_s0, 64 }
   0x5   :  { %p74_p0 = scmp.ne.s32.totalorder %s201_s0, %s73_s15  ;;  %p77_p1 = scmp.lt.u32.totalorder %s73_s15, %s201_s0 }
   0x7   :  { %p79_p2 = pnand %p77_p1, %p74_p0 }
   0x9   :  { %82 = shalt.err (!%p79_p2)
}
   0xa   :  { %s83_s20 = scalar_lea.vmem %s17_s10, 64  ;;  %p88_p4 = scmp.lt.s32.totalorder %s17_s10, %s17_s10 }
   0xb   :  { %p84_p3 = scmp.ne.s32.totalorder %s17_s10, %s83_s20  ;;  %p89_p5 = scmp.lt.s32.totalorder %s83_s20, %s83_s20 }
   0xd   :  { %p90_p6 = por %p89_p5, %p88_p4 }
   0xf   :  { %p91_p7 = pnand %p90_p6, %p84_p3 }
  0x11   :  { %94 = shalt.err (!%p91_p7)
}
  0x12   :  { %19 = dma.hbm_to_vmem [thread:$0]  %s201_s0, 64, %s17_s10, [#allocation3]  }
  0x13   :  { %s95_s25 = scalar_lea.hbm %s202_s1, 64 }
  0x14   :  { %p96_p8 = scmp.ne.s32.totalorder %s202_s1, %s95_s25  ;;  %p99_p9 = scmp.lt.u32.totalorder %s95_s25, %s202_s1 }
  0x16   :  { %p101_p10 = pnand %p99_p9, %p96_p8 }
  0x18   :  { %104 = shalt.err (!%p101_p10)
}
  0x19   :  { %s105_s30 = scalar_lea.vmem %s27_s12, 64  ;;  %p110_p12 = scmp.lt.s32.totalorder %s27_s12, %s27_s12 }
  0x1a   :  { %p106_p11 = scmp.ne.s32.totalorder %s27_s12, %s105_s30  ;;  %p111_p13 = scmp.lt.s32.totalorder %s105_s30, %s105_s30 }
  0x1c   :  { %p112_p0 = por %p111_p13, %p110_p12 }
  0x1e   :  { %p113_p1 = pnand %p112_p0, %p106_p11 }
  0x20   :  { %116 = shalt.err (!%p113_p1)
}
  0x21   :  { %29 = dma.hbm_to_vmem [thread:$0]  %s202_s1, 64, %s27_s12, [#allocation6]  }
  0x22   :  { %139 = dma.done.wait [#allocation3], 64  }
  0x23   :  { %140 = vsyncadd [#allocation3], 4294967232 }
  0x24   :  { %141 = dma.done.wait [#allocation6], 64  }
  0x25   :  { %142 = vsyncadd [#allocation6], 4294967232  ;;  %v37_v0 = vld [vmem:[#allocation5] sm:$0xf]  ;;  %s147_s4 = smov 16   ;;  %s148_s5 = smov 32  }
  0x26   :  { %39 = vrot.lane.b32.xlu0 %v37_v0, %s147_s4  ;;  %v36_v1 = vld [vmem:[#allocation2] sm:$0xf]  ;;  %vm46_vm0 = vcmask 130048   ;;  %s149_s6 = smov [#allocation7]   ;;  %vm48_vm1 = vcmask 261120   ;;  %vm50_vm2 = vcmask 265216  }
  0x27   :  { %s58_s7 = sshll.u32 %s149_s6, 4  ;;  %s59_s7 = int_to_ptr.vmem [resolvable:$true] %s58_s7 }
  0x28   :  { %s117_s1 = scalar_lea.vmem %s59_s7, 64  ;;  %p122_p3 = scmp.lt.s32.totalorder %s59_s7, %s59_s7 }
  0x29   :  { %p118_p2 = scmp.ne.s32.totalorder %s59_s7, %s117_s1  ;;  %p123_p4 = scmp.lt.s32.totalorder %s117_s1, %s117_s1 }
  0x2a   :  { %43 = vrot.lane.b32.xlu0 %v36_v1, %s148_s5 }
  0x2b   :  { %p124_p5 = por %p123_p4, %p122_p3 }
  0x2d   :  { %p125_p6 = pnand %p124_p5, %p118_p2 }
  0x98   :  { %v40_v2 = vpop.permute.xlu0 %39 }
  0x99   :  { %v47_v3 = vsel %vm46_vm0, %v36_v1, %v40_v2 }
  0x9c   :  { %v44_v4 = vpop.permute.xlu0 %43 }
  0x9d   :  { %v49_v5 = vsel %vm48_vm1, %v47_v3, %v44_v4 }
  0x9e   :  { %51 = vst.msk [vmem:[#allocation7] sm:$0xf] %vm50_vm2, %v49_v5 }
  0x9f   :  { %128 = shalt.err (!%p125_p6)
}
  0xa0   :  { %s129_s10 = scalar_lea.hbm %s203_s2, 64 }
  0xa1   :  { %p130_p7 = scmp.ne.s32.totalorder %s203_s2, %s129_s10  ;;  %p133_p8 = scmp.lt.u32.totalorder %s129_s10, %s203_s2 }
  0xa3   :  { %p135_p9 = pnand %p133_p8, %p130_p7 }
  0xa5   :  { %138 = shalt.err (!%p135_p9)
}
  0xa6   :  { %61 = dma.vmem_to_hbm [thread:$0]  %s59_s7, 64, %s203_s2, [#allocation4]  }
  0xa7   :  { %143 = dma.done.wait [#allocation4], 64  }
  0xa8   :  { %144 = vsyncadd [#allocation4], 4294967232 }
  0xa9   :  { %65 = vsyncpa [#allocation3], 1 }
  0xaa   :  { %66 = vsyncpa [#allocation6], 1 }
  0xab   :  { %67 = vsyncpa [#allocation4], 1 }

</bundles_post_ra>
